<compile_context>
chip_gen: v5e
topology: v5e:2x2
jax: 0.10.0
libtpu: 0.0.40
codegen_flags: <defaults>
</compile_context>

<pallas_src>
import jax
import jax.numpy as jnp
from jax.experimental import pallas as pl
from jax.experimental.pallas import tpu as pltpu


def _round_up(n: int, m: int) -> int:
    return ((n + m - 1) // m) * m


def _mlp_kernel(x_ref, w1_ref, b1_ref, w3_ref, b3_ref, o_ref, h_ref):
    # fc1 is recomputed only when entering a new batch tile (j == 0); its ReLU
    # output is cached in VMEM scratch and reused across all output tiles j.
    @pl.when(pl.program_id(1) == 0)
    def _():
        x = x_ref[...].astype(w1_ref.dtype)               # f32 -> bf16 (VPU, hidden under MXU)
        h = jnp.dot(x, w1_ref[...], preferred_element_type=jnp.float32)
        h_ref[...] = jnp.maximum(h + b1_ref[...], 0.0)    # bias + ReLU in f32

    y = jnp.dot(h_ref[...].astype(w3_ref.dtype), w3_ref[...],
                preferred_element_type=jnp.float32)
    o_ref[...] = (y + b3_ref[...]).astype(o_ref.dtype)


def prepare_mlp_exp05_params(w1, b1, w3, b3, compute_dtype=jnp.bfloat16):
    """Cast / reshape the weights ONCE (hoisted out of the per-call path).

    w1: (D_in, H), b1: (H,) or (1, H), w3: (H, D_out), b3: (D_out,) or (1, D_out)
    """
    w1 = jnp.asarray(w1).astype(compute_dtype)
    w3 = jnp.asarray(w3).astype(compute_dtype)
    b1 = jnp.asarray(b1).reshape(1, -1).astype(jnp.float32)
    b3 = jnp.asarray(b3).reshape(1, -1).astype(jnp.float32)
    return w1, b1, w3, b3


def _vmem_capacity_bytes() -> int:
    try:
        return int(pltpu.get_tpu_info().vmem_capacity_bytes)
    except Exception:
        return 64 * 2 ** 20   # conservative fallback (v7x-sized)


def _maybe_single_buffered(shape, index_map, single: bool):
    if single:
        try:
            return pl.BlockSpec(shape, index_map, pipeline_mode=pl.Buffered(1))
        except TypeError:   # older jax without pipeline_mode
            return pl.BlockSpec(shape, index_map)
    return pl.BlockSpec(shape, index_map)


def mlp_exp05(x, w1, b1, w3, b3, *, out_dtype=None):
    """Forward pass of MLPexp05: relu(x @ w1 + b1) @ w3 + b3.

    Expects params already prepared by `prepare_mlp_exp05_params`
    (w1/w3 bf16, b1/b3 f32 of shape (1, H)/(1, D_out)).  x stays f32 and is
    cast inside the kernel.  MXU matmuls use bf16 inputs with f32 accumulation.
    """
    B, D_in = x.shape
    H, D_out = w3.shape
    assert w1.shape == (D_in, H)
    out_dtype = x.dtype if out_dtype is None else out_dtype
    out_bytes = jnp.dtype(out_dtype).itemsize

    # ---- Generation-aware VMEM planning (all shape math is trace-time). ----
    vmem_cap = _vmem_capacity_bytes()
    budget = int(vmem_cap * 0.7)

    w1_bytes = D_in * H * 2 + H * 4                     # w1 bf16 + b1 f32 (single-buffered)
    w3_full_bytes = H * D_out * 2 + D_out * 4           # w3 bf16 + b3 f32

    # Output-feature tile: keep all of w3 resident when it fits; otherwise tile
    # D_out in 128-lane multiples (extra grid axis; fc1 result cached in VMEM).
    if w1_bytes + w3_full_bytes <= budget // 2:
        tn = D_out
    else:
        tn = 1024
        while tn > 128 and w1_bytes + 2 * (H * tn * 2 + tn * 4) > budget // 2:
            tn //= 2
        # TODO(synk): if w1 alone exceeds the VMEM budget, an additional grid
        # axis over H (f32 accumulator + pl.when init/finalize) would be needed.
    n_j = (D_out + tn - 1) // tn
    D_out_p = n_j * tn
    w3_bufs = 1 if n_j == 1 else 2                      # resident vs pipelined
    weights_bytes = w1_bytes + w3_bufs * (H * tn * 2 + tn * 4)

    # Batch tile: small batches -> one 8-aligned tile (no 16x padding waste);
    # large batches -> biggest 128-multiple that fits, capped at 1024, keeping
    # >= 2 batch tiles so the "parallel" axis shards across v7x's 2 TCs.
    per_row = 2 * D_in * 4 + 2 * tn * out_bytes + H * 4
    tb_cap = max(8, (budget - weights_bytes) // per_row)
    if B <= 128:
        tb = min(_round_up(B, 8), max(8, (tb_cap // 8) * 8))
    else:
        tb = min(1024, tb_cap, B)
        tb = max(128, (tb // 128) * 128)
        while tb > 128 and (B + tb - 1) // tb < 2:
            tb //= 2
    n_i = (B + tb - 1) // tb
    B_p = n_i * tb

    # ---- Pad only when actually needed. ----
    x_in = x if B_p == B else jnp.pad(x, ((0, B_p - B), (0, 0)))
    if D_out_p != D_out:
        # Large-weight fallback path only; the common case does no D_out pad.
        w3_in = jnp.pad(w3, ((0, 0), (0, D_out_p - D_out)))
        b3_in = jnp.pad(b3, ((0, 0), (0, D_out_p - D_out)))
    else:
        w3_in, b3_in = w3, b3

    # ---- Cost estimate & VMEM limit. ----
    flops = 2 * B_p * D_in * H + 2 * B_p * H * D_out_p
    bytes_accessed = (B_p * D_in * 4 + D_in * H * 2 + H * 4
                      + H * D_out_p * 2 + D_out_p * 4
                      + B_p * D_out_p * out_bytes)
    cost = pl.CostEstimate(flops=int(flops), transcendentals=0,
                           bytes_accessed=int(bytes_accessed))

    needed = (weights_bytes
              + 2 * tb * D_in * 4          # x tile, double-buffered, f32
              + 2 * tb * tn * out_bytes    # out tile, double-buffered
              + tb * H * 4)                # fc1 activation scratch
    vmem_limit = max(needed + max(needed // 4, 4 * 2 ** 20), 32 * 2 ** 20)
    vmem_limit = int(min(vmem_limit, int(vmem_cap * 0.85)))

    in_specs = [
        pl.BlockSpec((tb, D_in), lambda i, j: (i, 0)),                       # x: batch-tiled
        _maybe_single_buffered((D_in, H), lambda i, j: (0, 0), True),        # w1: resident
        _maybe_single_buffered((1, H), lambda i, j: (0, 0), True),           # b1: resident
        _maybe_single_buffered((H, tn), lambda i, j: (0, j), n_j == 1),      # w3
        _maybe_single_buffered((1, tn), lambda i, j: (0, j), n_j == 1),      # b3
    ]
    out_spec = pl.BlockSpec((tb, tn), lambda i, j: (i, j))

    out = pl.pallas_call(
        _mlp_kernel,
        out_shape=jax.ShapeDtypeStruct((B_p, D_out_p), out_dtype),
        grid_spec=pltpu.PrefetchScalarGridSpec(
            num_scalar_prefetch=0,
            grid=(n_i, n_j),
            in_specs=in_specs,
            out_specs=out_spec,
            scratch_shapes=[pltpu.VMEM((tb, H), jnp.float32)],
        ),
        compiler_params=pltpu.CompilerParams(
            dimension_semantics=("parallel", "arbitrary"),
            vmem_limit_bytes=vmem_limit,
        ),
        cost_estimate=cost,
    )(x_in, w1, b1, w3_in, b3_in)

    if B_p != B or D_out_p != D_out:
        out = out[:B, :D_out]
    return out


if __name__ == "__main__":
    # Small shapes consistent with the module: Linear(input_dim, hidden),
    # Linear(hidden, output_dim).
    B, D_in, H, D_out = 8, 32, 128, 16

    key = jax.random.PRNGKey(0)
    k_x, k_w1, k_b1, k_w3, k_b3 = jax.random.split(key, 5)

    x = jax.random.normal(k_x, (B, D_in), dtype=jnp.float32)
    # PyTorch-style uniform(-1/sqrt(fan_in), 1/sqrt(fan_in)) init.
    lim1 = 1.0 / (D_in ** 0.5)
    w1 = jax.random.uniform(k_w1, (D_in, H), jnp.float32, -lim1, lim1)
    b1 = jax.random.uniform(k_b1, (H,), jnp.float32, -lim1, lim1)
    lim3 = 1.0 / (H ** 0.5)
    w3 = jax.random.uniform(k_w3, (H, D_out), jnp.float32, -lim3, lim3)
    b3 = jax.random.uniform(k_b3, (D_out,), jnp.float32, -lim3, lim3)

    # Weights cast / reshaped once, reused for every forward call.
    params = prepare_mlp_exp05_params(w1, b1, w3, b3)
    fwd = jax.jit(mlp_exp05)

    out = jax.block_until_ready(fwd(x, *params))
    assert out.shape == (B, D_out)

    # Reference matching the kernel's bf16-input / f32-accumulation numerics
    # (tight tolerance).
    to_bf = lambda a: a.astype(jnp.bfloat16).astype(jnp.float32)
    h_ref = jnp.maximum(to_bf(x) @ to_bf(w1) + b1, 0.0)
    ref_bf = to_bf(h_ref) @ to_bf(w3) + b3
    assert jnp.allclose(out, ref_bf, atol=1e-3, rtol=1e-3)

    # Pure-f32 reference (PyTorch module semantics); looser tolerance due to
    # bf16 MXU inputs.
    ref_f32 = jnp.maximum(x @ w1 + b1, 0.0) @ w3 + b3
    assert jnp.allclose(out, ref_f32, atol=5e-2, rtol=5e-2)

    print("KERNEL_OK")
</pallas_src>

<mosaic_0001>
module attributes {stable_mosaic.version = 11 : i64} {
  func.func @_mlp_kernel(%arg0: i32, %arg1: i32, %arg2: memref<8x32xf32, #tpu.memory_space<vmem>>, %arg3: memref<32x128xbf16, #tpu.memory_space<vmem>>, %arg4: memref<1x128xf32, #tpu.memory_space<vmem>>, %arg5: memref<128x16xbf16, #tpu.memory_space<vmem>>, %arg6: memref<1x16xf32, #tpu.memory_space<vmem>>, %arg7: memref<8x16xf32, #tpu.memory_space<vmem>>, %arg8: memref<8x128xf32, #tpu.memory_space<vmem>>) attributes {dimension_semantics = [#tpu.dimension_semantics<parallel>, #tpu.dimension_semantics<arbitrary>], iteration_bounds = array<i64: 1, 1>, scalar_prefetch = 0 : i64, scratch_operands = 1 : i64, tpu.core_type = #tpu.core_type<tc>, window_params = [{transform_indices = @transform_0, window_bounds = array<i64: 8, 32>}, {pipeline_mode = #tpu.pipeline_mode<synchronous>, transform_indices = @transform_1, window_bounds = array<i64: 32, 128>}, {pipeline_mode = #tpu.pipeline_mode<synchronous>, transform_indices = @transform_2, window_bounds = array<i64: 1, 128>}, {pipeline_mode = #tpu.pipeline_mode<synchronous>, transform_indices = @transform_3, window_bounds = array<i64: 128, 16>}, {pipeline_mode = #tpu.pipeline_mode<synchronous>, transform_indices = @transform_4, window_bounds = array<i64: 1, 16>}, {transform_indices = @transform_5, window_bounds = array<i64: 8, 16>}]} {
    %c0_i32 = arith.constant 0 : i32
    %0 = arith.cmpi eq, %arg1, %c0_i32 : i32
    %1 = arith.extui %0 : i1 to i32
    %c0_i32_0 = arith.constant 0 : i32
    %2 = arith.cmpi ne, %1, %c0_i32_0 : i32
    scf.if %2 {
      %c0_8 = arith.constant 0 : index
      %c0_9 = arith.constant 0 : index
      %11 = vector.load %arg2[%c0_8, %c0_9] : memref<8x32xf32, #tpu.memory_space<vmem>>, vector<8x32xf32>
      %12 = arith.truncf %11 : vector<8x32xf32> to vector<8x32xbf16>
      %c0_10 = arith.constant 0 : index
      %c0_11 = arith.constant 0 : index
      %13 = vector.load %arg3[%c0_10, %c0_11] : memref<32x128xbf16, #tpu.memory_space<vmem>>, vector<32x128xbf16>
      %cst_12 = arith.constant dense<0.000000e+00> : vector<8x128xf32>
      %14 = tpu.matmul %12, %13, %cst_12 {dimension_numbers = #tpu.dot_dimension_numbers<[1], [0], [0], [1], [0, 0, 1, 1], [], []>} : vector<8x32xbf16>, vector<32x128xbf16>, vector<8x128xf32> -> vector<8x128xf32>
      %c0_13 = arith.constant 0 : index
      %c0_14 = arith.constant 0 : index
      %15 = vector.load %arg4[%c0_13, %c0_14] : memref<1x128xf32, #tpu.memory_space<vmem>>, vector<1x128xf32>
      %16 = vector.broadcast %15 : vector<1x128xf32> to vector<8x128xf32>
      %17 = arith.addf %14, %16 : vector<8x128xf32>
      %cst_15 = arith.constant 0.000000e+00 : f32
      %18 = vector.broadcast %cst_15 : f32 to vector<8x128xf32>
      %19 = arith.maximumf %17, %18 : vector<8x128xf32>
      %c0_16 = arith.constant 0 : index
      %c0_17 = arith.constant 0 : index
      %20 = vector.load %arg8[%c0_16, %c0_17] : memref<8x128xf32, #tpu.memory_space<vmem>>, vector<8x128xf32>
      tpu.vector_store %arg8[%c0_16, %c0_17], %19 {strides = array<i32>} : memref<8x128xf32, #tpu.memory_space<vmem>>, vector<8x128xf32>,
    } else {
    }
    %c0 = arith.constant 0 : index
    %c0_1 = arith.constant 0 : index
    %3 = vector.load %arg8[%c0, %c0_1] : memref<8x128xf32, #tpu.memory_space<vmem>>, vector<8x128xf32>
    %4 = arith.truncf %3 : vector<8x128xf32> to vector<8x128xbf16>
    %c0_2 = arith.constant 0 : index
    %c0_3 = arith.constant 0 : index
    %5 = vector.load %arg5[%c0_2, %c0_3] : memref<128x16xbf16, #tpu.memory_space<vmem>>, vector<128x16xbf16>
    %cst = arith.constant dense<0.000000e+00> : vector<8x16xf32>
    %6 = tpu.matmul %4, %5, %cst {dimension_numbers = #tpu.dot_dimension_numbers<[1], [0], [0], [1], [0, 0, 1, 1], [], []>} : vector<8x128xbf16>, vector<128x16xbf16>, vector<8x16xf32> -> vector<8x16xf32>
    %c0_4 = arith.constant 0 : index
    %c0_5 = arith.constant 0 : index
    %7 = vector.load %arg6[%c0_4, %c0_5] : memref<1x16xf32, #tpu.memory_space<vmem>>, vector<1x16xf32>
    %8 = vector.broadcast %7 : vector<1x16xf32> to vector<8x16xf32>
    %9 = arith.addf %6, %8 : vector<8x16xf32>
    %c0_6 = arith.constant 0 : index
    %c0_7 = arith.constant 0 : index
    %10 = vector.load %arg7[%c0_6, %c0_7] : memref<8x16xf32, #tpu.memory_space<vmem>>, vector<8x16xf32>
    tpu.vector_store %arg7[%c0_6, %c0_7], %9 {strides = array<i32>} : memref<8x16xf32, #tpu.memory_space<vmem>>, vector<8x16xf32>,
    return
  }
  func.func @transform_0(%arg0: i32, %arg1: i32) -> (i32, i32) {
    %c0_i32 = arith.constant 0 : i32
    %c0_i32_0 = arith.constant 0 : i32
    return %arg0, %c0_i32 : i32, i32
  }
  func.func @transform_1(%arg0: i32, %arg1: i32) -> (i32, i32) {
    %c0_i32 = arith.constant 0 : i32
    %c0_i32_0 = arith.constant 0 : i32
    %c0_i32_1 = arith.constant 0 : i32
    return %c0_i32, %c0_i32_0 : i32, i32
  }
  func.func @transform_2(%arg0: i32, %arg1: i32) -> (i32, i32) {
    %c0_i32 = arith.constant 0 : i32
    %c0_i32_0 = arith.constant 0 : i32
    %c0_i32_1 = arith.constant 0 : i32
    return %c0_i32, %c0_i32_0 : i32, i32
  }
  func.func @transform_3(%arg0: i32, %arg1: i32) -> (i32, i32) {
    %c0_i32 = arith.constant 0 : i32
    %c0_i32_0 = arith.constant 0 : i32
    return %c0_i32, %arg1 : i32, i32
  }
  func.func @transform_4(%arg0: i32, %arg1: i32) -> (i32, i32) {
    %c0_i32 = arith.constant 0 : i32
    %c0_i32_0 = arith.constant 0 : i32
    return %c0_i32, %arg1 : i32, i32
  }
  func.func @transform_5(%arg0: i32, %arg1: i32) -> (i32, i32) {
    %c0_i32 = arith.constant 0 : i32
    return %arg0, %arg1 : i32, i32
  }
}

</mosaic_0001>

<bundles_post_ra>
// kernel: mlp_exp05.1
= control target key start
LH: loop header
LB: loop body
LE: loop exit
PB: predicated region body
PF: predicated region fallthrough
CT: control target
= control target key end

     0   :  { %s321_s0 = inlined_call_operand.vmem [shape: f32[8,32], index: 0, kind: input, shape index: {}]   ;;  %s322_s1 = inlined_call_operand.vmem [shape: bf16[32,128], index: 1, kind: input, shape index: {}]   ;;  %s323_s2 = inlined_call_operand.vmem [shape: f32[1,128], index: 2, kind: input, shape index: {}]   ;;  %s324_s3 = inlined_call_operand.vmem [shape: bf16[128,16], index: 3, kind: input, shape index: {}]   ;;  %s325_s4 = inlined_call_operand.vmem [shape: f32[1,16], index: 4, kind: input, shape index: {}]   ;;  %s326_s5 = inlined_call_operand.hbm [shape: f32[8,16], index: 5, kind: output, shape index: {}]  }
   0x1   :  { %v210_v0 = vld [vmem:[%s322_s1 + $0x8] sm:$0xff]  ;;  %v218_v1 = vld [vmem:[%s324_s3 + $0x38] sm:$0xff]  ;;  %v209_v2 = vld [vmem:[%s322_s1] sm:$0xff] }
   0x2   :  { %58 = vmatpush.bf16.msra.mxu0 %v210_v0  ;;  %v26_v3 = vld [vmem:[%s321_s0] sm:$0xff]  ;;  %137 = vmatpush.bf16.msra.mxu1 %v218_v1  ;;  %v217_v4 = vld [vmem:[%s324_s3 + $0x30] sm:$0xff] }
   0x3   :  { %10 = vsyncpa [#allocation4], 0  ;;  %v27_v5 = vpack.c.bf16 %v26_v3, %v26_v3  ;;  %vm48_vm0 = vcmask 261120   ;;  %v216_v6 = vld [vmem:[%s324_s3 + $0x28] sm:$0xff]  ;;  %v215_v7 = vld [vmem:[%s324_s3 + $0x20] sm:$0xff]  ;;  %s248_s17 = smov [#allocation3]  }
   0x4   :  { %v214_v8 = vld [vmem:[%s324_s3 + $0x18] sm:$0xff]  ;;  %v213_v9 = vld [vmem:[%s324_s3 + $0x10] sm:$0xff]  ;;  %v212_v10 = vld [vmem:[%s324_s3 + $0x8] sm:$0xff]  ;;  %s157_s18 = sshll.u32 %s248_s17, 4  ;;  %vm150_vm1 = vcmask 130048   ;;  %s158_s18 = int_to_ptr.vmem [resolvable:$true] %s157_s18 }
   0x5   :  { %v211_v11 = vld [vmem:[%s324_s3] sm:$0xff]  ;;  %s159_s3 = sshll.u32 %s326_s5, 4  ;;  %s160_s3 = int_to_ptr.hbm [resolvable:$true] %s159_s3 }
   0x6   :  { %59 = vmatpush.bf16.msra.mxu0 %v209_v2  ;;  %138 = vmatpush.bf16.msra.mxu1 %v217_v4  ;;  %v220_v12 = vld [vmem:[%s323_s2] ss:$0 sm:$0xff] }
   0x7   :  { %v221_v18 = vld [vmem:[%s325_s4] ss:$0 sm:$0xff] }
   0x9   :  { %176 = vmatmul.msk.bf16.vlgmr.msra.gmra.mxu0 %vm48_vm0, %v27_v5 }
   0xa   :  { %139 = vmatpush.bf16.msra.mxu1 %v216_v6 }
   0xe   :  { %140 = vmatpush.bf16.msra.mxu1 %v215_v7 }
  0x12   :  { %141 = vmatpush.bf16.msra.mxu1 %v214_v8 }
  0x16   :  { %142 = vmatpush.bf16.msra.mxu1 %v213_v9 }
  0x1a   :  { %143 = vmatpush.bf16.msra.mxu1 %v212_v10 }
  0x1e   :  { %144 = vmatpush.bf16.msra.mxu1 %v211_v11 }
  0x86   :  { %v61_v13 = vpop.f32.mrf.mxu0 }
  0x87   :  { %v62_v14 = vadd.f32 %v220_v12, %v61_v13 }
  0x89   :  { %v65_v15 = vmax.f32 %v62_v14, 0.0 }
  0x8b   :  { %v68_v16 = vpack.c.bf16 %v65_v15, %v65_v15 }
  0x8d   :  { %145 = vmatmul.bf16.vlgmr.msra.gmra.mxu1 %v68_v16 }
  0x8e   :  { %v63_v17 = vpop.f32.mrf.mxu0 }
 0x10a   :  { %v146_v19 = vpop.f32.mrf.mxu1 }
 0x10b   :  { %v147_v20 = vadd.f32 %v221_v18, %v146_v19 }
 0x10d   :  { %151 = vst.msk [vmem:[#allocation3] sm:$0xff] %vm150_vm1, %v147_v20 }
 0x10e   :  { %162 = dma.vmem_to_hbm [thread:$0]  %s158_s18, 128, %s160_s3, [#allocation4]  }
 0x112   :  { %v148_v21 = vpop.f32.mrf.mxu1 }
 0x113   :  { %246 = dma.done.wait [#allocation4], 128  }
 0x114   :  { %247 = vsyncadd [#allocation4], 4294967168 }
 0x115   :  { %167 = vsyncpa [#allocation4], 1 }

</bundles_post_ra>
